<compile_context>
chip_gen: v7x
topology: tpu7x:2x2x1
jax: 0.10.0
libtpu: 0.0.40
codegen_flags: <defaults>
</compile_context>

<pallas_src>
import numpy as np
import jax
import jax.numpy as jnp
from jax import lax
from jax.experimental import pallas as pl
from jax.experimental.pallas import tpu as pltpu

LN_EPS = 1e-5
LANE = 128


def _round_up(a, m):
    return ((a + m - 1) // m) * m


def decoder_res_kernel(x_ref, w1_ref, vec_ref, wfc_ref, bfc_ref, out_ref):
    # x_ref   : (TN, H)      f32 row tile of hidden_states
    # w1_ref  : (H, H)       bf16 MLP linear weight (input-major: y = x @ w1 + b1)
    # vec_ref : (3, H)       f32 packed [b1; ln_gamma; ln_beta]
    # wfc_ref : (H, OUT_P)   bf16 fc weight, zero-padded to 128 lanes
    # bfc_ref : (1, OUT_P)   f32 fc bias, zero-padded to 128 lanes
    # out_ref : (TN, OUT_P)  f32 lane-dense output slab
    x = x_ref[...]                                            # (TN, H) f32
    b1 = vec_ref[0:1, :]                                      # (1, H)
    gamma = vec_ref[1:2, :]
    beta = vec_ref[2:3, :]

    # MLP: Linear (bf16 MXU, f32 accumulate) -> LayerNorm (f32) -> ReLU
    h = jnp.dot(x.astype(jnp.bfloat16), w1_ref[...],
                preferred_element_type=jnp.float32) + b1      # (TN, H) f32
    mu = jnp.mean(h, axis=-1, keepdims=True)
    c = h - mu
    var = jnp.mean(c * c, axis=-1, keepdims=True)
    h = c * lax.rsqrt(var + LN_EPS) * gamma + beta
    h = jnp.maximum(h, 0.0)

    # residual + fc (bf16 MXU, f32 accumulate), lane-dense store
    y = x + h                                                 # f32
    out_ref[...] = (jnp.dot(y.astype(jnp.bfloat16), wfc_ref[...],
                            preferred_element_type=jnp.float32)
                    + bfc_ref[...])


def decoder_res_forward(x, w1, b1, gamma, beta, wfc, bfc, *, tile_n=None):
    """x: (N, H) float32. Returns (N, out_features) float32."""
    n, h = x.shape
    out_f = wfc.shape[1]
    out_p = _round_up(out_f, LANE)                 # lane-dense output width

    if tile_n is None:
        if n <= 512:
            # one big tile: fills MXU rows, no per-step pipeline overhead
            tile_n = _round_up(n, 8)
        else:
            # multiple steps -> 'parallel' grid axis shards across TCs on v7x
            tile_n = 256
    n_pad = _round_up(n, tile_n)

    # wrapper-side layout plumbing (pure padding / packing / casts)
    x_p = x if n_pad == n else jnp.pad(x, ((0, n_pad - n), (0, 0)))
    vec = jnp.stack([b1, gamma, beta], axis=0)                       # (3, H) packed slab
    w1_b = w1.astype(jnp.bfloat16)                                   # (H, H) bf16
    wfc_p = jnp.pad(wfc, ((0, 0), (0, out_p - out_f))).astype(jnp.bfloat16)  # (H, OUT_P)
    bfc_p = jnp.pad(bfc, (0, out_p - out_f)).reshape(1, out_p)       # (1, OUT_P) f32

    grid = (n_pad // tile_n,)
    out = pl.pallas_call(
        decoder_res_kernel,
        out_shape=jax.ShapeDtypeStruct((n_pad, out_p), jnp.float32),
        grid_spec=pltpu.PrefetchScalarGridSpec(
            num_scalar_prefetch=0,
            grid=grid,
            in_specs=[
                pl.BlockSpec((tile_n, h), lambda i: (i, 0)),   # x: row-tiled
                pl.BlockSpec((h, h), lambda i: (0, 0)),        # w1: resident (bf16)
                pl.BlockSpec((3, h), lambda i: (0, 0)),        # packed b1/gamma/beta
                pl.BlockSpec((h, out_p), lambda i: (0, 0)),    # wfc: resident (bf16)
                pl.BlockSpec((1, out_p), lambda i: (0, 0)),    # bfc
            ],
            out_specs=pl.BlockSpec((tile_n, out_p), lambda i: (i, 0)),
        ),
        compiler_params=pltpu.CompilerParams(
            dimension_semantics=("parallel",)),                # row tiles shard across TCs
    )(x_p, w1_b, vec, wfc_p, bfc_p)

    return out[:n, :out_f]


# ----------------------------------------------------------------------------
if __name__ == "__main__":
    key = jax.random.PRNGKey(0)
    B, S, H, OUT = 2, 8, 128, 60          # hidden_size=128, out_features=60 (module default)
    N = B * S

    ks = jax.random.split(key, 8)
    x = jax.random.normal(ks[0], (B, S, H), jnp.float32)
    w1 = jax.random.normal(ks[1], (H, H), jnp.float32) * (1.0 / np.sqrt(H))
    b1 = 0.02 * jax.random.normal(ks[2], (H,), jnp.float32)
    gamma = 1.0 + 0.1 * jax.random.normal(ks[3], (H,), jnp.float32)
    beta = 0.02 * jax.random.normal(ks[4], (H,), jnp.float32)
    wfc = jax.random.normal(ks[5], (H, OUT), jnp.float32) * (1.0 / np.sqrt(H))
    bfc = 0.02 * jax.random.normal(ks[6], (OUT,), jnp.float32)

    x2 = x.reshape(N, H)
    out = decoder_res_forward(x2, w1, b1, gamma, beta, wfc, bfc)
    out = jax.block_until_ready(out).reshape(B, S, OUT)

    # pure-JAX f32 reference of the same forward
    def reference(xf):
        hh = xf @ w1 + b1
        mu = hh.mean(-1, keepdims=True)
        var = ((hh - mu) ** 2).mean(-1, keepdims=True)
        hh = (hh - mu) / jnp.sqrt(var + LN_EPS) * gamma + beta
        hh = jnp.maximum(hh, 0.0)
        yy = xf + hh
        return yy @ wfc + bfc

    expected = jax.block_until_ready(reference(x2)).reshape(B, S, OUT)
    # bf16 MXU operands with f32 accumulation -> slightly looser tolerance than pure f32
    np.testing.assert_allclose(np.asarray(out), np.asarray(expected),
                               rtol=2e-2, atol=2e-2)
    print("KERNEL_OK")
</pallas_src>

<mosaic_0001>
module attributes {stable_mosaic.version = 11 : i64} {
  func.func @decoder_res_kernel(%arg0: i32, %arg1: memref<16x128xf32, #tpu.memory_space<vmem>>, %arg2: memref<128x128xbf16, #tpu.memory_space<vmem>>, %arg3: memref<3x128xf32, #tpu.memory_space<vmem>>, %arg4: memref<128x128xbf16, #tpu.memory_space<vmem>>, %arg5: memref<1x128xf32, #tpu.memory_space<vmem>>, %arg6: memref<16x128xf32, #tpu.memory_space<vmem>>) attributes {dimension_semantics = [#tpu.dimension_semantics<parallel>], iteration_bounds = array<i64: 1>, scalar_prefetch = 0 : i64, scratch_operands = 0 : i64, tpu.core_type = #tpu.core_type<tc>, window_params = [{transform_indices = @transform_0, window_bounds = array<i64: 16, 128>}, {pipeline_mode = #tpu.pipeline_mode<synchronous>, transform_indices = @transform_1, window_bounds = array<i64: 128, 128>}, {pipeline_mode = #tpu.pipeline_mode<synchronous>, transform_indices = @transform_2, window_bounds = array<i64: 3, 128>}, {pipeline_mode = #tpu.pipeline_mode<synchronous>, transform_indices = @transform_3, window_bounds = array<i64: 128, 128>}, {pipeline_mode = #tpu.pipeline_mode<synchronous>, transform_indices = @transform_4, window_bounds = array<i64: 1, 128>}, {transform_indices = @transform_5, window_bounds = array<i64: 16, 128>}]} {
    %c0 = arith.constant 0 : index
    %c0_0 = arith.constant 0 : index
    %0 = vector.load %arg1[%c0, %c0_0] : memref<16x128xf32, #tpu.memory_space<vmem>>, vector<16x128xf32>
    %c0_1 = arith.constant 0 : index
    %c0_2 = arith.constant 0 : index
    %1 = vector.load %arg3[%c0_1, %c0_2] : memref<3x128xf32, #tpu.memory_space<vmem>>, vector<1x128xf32>
    %c1 = arith.constant 1 : index
    %c0_3 = arith.constant 0 : index
    %2 = vector.load %arg3[%c1, %c0_3] : memref<3x128xf32, #tpu.memory_space<vmem>>, vector<1x128xf32>
    %c2 = arith.constant 2 : index
    %c0_4 = arith.constant 0 : index
    %3 = vector.load %arg3[%c2, %c0_4] : memref<3x128xf32, #tpu.memory_space<vmem>>, vector<1x128xf32>
    %4 = arith.truncf %0 : vector<16x128xf32> to vector<16x128xbf16>
    %c0_5 = arith.constant 0 : index
    %c0_6 = arith.constant 0 : index
    %5 = vector.load %arg2[%c0_5, %c0_6] : memref<128x128xbf16, #tpu.memory_space<vmem>>, vector<128x128xbf16>
    %cst = arith.constant dense<0.000000e+00> : vector<16x128xf32>
    %6 = tpu.matmul %4, %5, %cst {dimension_numbers = #tpu.dot_dimension_numbers<[1], [0], [0], [1], [0, 0, 1, 1], [], []>} : vector<16x128xbf16>, vector<128x128xbf16>, vector<16x128xf32> -> vector<16x128xf32>
    %7 = vector.broadcast %1 : vector<1x128xf32> to vector<16x128xf32>
    %8 = arith.addf %6, %7 : vector<16x128xf32>
    %cst_7 = arith.constant dense<0.000000e+00> : vector<16xf32>
    %9 = vector.multi_reduction <add>, %8, %cst_7 [1] : vector<16x128xf32> to vector<16xf32>
    %10 = vector.shape_cast %9 : vector<16xf32> to vector<16x1xf32>
    %cst_8 = arith.constant 1.280000e+02 : f32
    %11 = vector.broadcast %cst_8 : f32 to vector<16x1xf32>
    %12 = arith.divf %10, %11 : vector<16x1xf32>
    %13 = vector.broadcast %12 : vector<16x1xf32> to vector<16x128xf32>
    %14 = arith.subf %8, %13 : vector<16x128xf32>
    %15 = arith.mulf %14, %14 : vector<16x128xf32>
    %cst_9 = arith.constant dense<0.000000e+00> : vector<16xf32>
    %16 = vector.multi_reduction <add>, %15, %cst_9 [1] : vector<16x128xf32> to vector<16xf32>
    %17 = vector.shape_cast %16 : vector<16xf32> to vector<16x1xf32>
    %cst_10 = arith.constant 1.280000e+02 : f32
    %18 = vector.broadcast %cst_10 : f32 to vector<16x1xf32>
    %19 = arith.divf %17, %18 : vector<16x1xf32>
    %cst_11 = arith.constant 9.99999974E-6 : f32
    %20 = vector.broadcast %cst_11 : f32 to vector<16x1xf32>
    %21 = arith.addf %19, %20 : vector<16x1xf32>
    %22 = math.rsqrt %21 : vector<16x1xf32>
    %23 = vector.broadcast %22 : vector<16x1xf32> to vector<16x128xf32>
    %24 = arith.mulf %14, %23 : vector<16x128xf32>
    %25 = vector.broadcast %2 : vector<1x128xf32> to vector<16x128xf32>
    %26 = arith.mulf %24, %25 : vector<16x128xf32>
    %27 = vector.broadcast %3 : vector<1x128xf32> to vector<16x128xf32>
    %28 = arith.addf %26, %27 : vector<16x128xf32>
    %cst_12 = arith.constant 0.000000e+00 : f32
    %29 = vector.broadcast %cst_12 : f32 to vector<16x128xf32>
    %30 = arith.maximumf %28, %29 : vector<16x128xf32>
    %31 = arith.addf %0, %30 : vector<16x128xf32>
    %32 = arith.truncf %31 : vector<16x128xf32> to vector<16x128xbf16>
    %c0_13 = arith.constant 0 : index
    %c0_14 = arith.constant 0 : index
    %33 = vector.load %arg4[%c0_13, %c0_14] : memref<128x128xbf16, #tpu.memory_space<vmem>>, vector<128x128xbf16>
    %cst_15 = arith.constant dense<0.000000e+00> : vector<16x128xf32>
    %34 = tpu.matmul %32, %33, %cst_15 {dimension_numbers = #tpu.dot_dimension_numbers<[1], [0], [0], [1], [0, 0, 1, 1], [], []>} : vector<16x128xbf16>, vector<128x128xbf16>, vector<16x128xf32> -> vector<16x128xf32>
    %c0_16 = arith.constant 0 : index
    %c0_17 = arith.constant 0 : index
    %35 = vector.load %arg5[%c0_16, %c0_17] : memref<1x128xf32, #tpu.memory_space<vmem>>, vector<1x128xf32>
    %36 = vector.broadcast %35 : vector<1x128xf32> to vector<16x128xf32>
    %37 = arith.addf %34, %36 : vector<16x128xf32>
    %c0_18 = arith.constant 0 : index
    %c0_19 = arith.constant 0 : index
    %38 = vector.load %arg6[%c0_18, %c0_19] : memref<16x128xf32, #tpu.memory_space<vmem>>, vector<16x128xf32>
    tpu.vector_store %arg6[%c0_18, %c0_19], %37 {strides = array<i32>} : memref<16x128xf32, #tpu.memory_space<vmem>>, vector<16x128xf32>,
    return
  }
  func.func @transform_0(%arg0: i32) -> (i32, i32) {
    %c0_i32 = arith.constant 0 : i32
    %c0_i32_0 = arith.constant 0 : i32
    return %arg0, %c0_i32 : i32, i32
  }
  func.func @transform_1(%arg0: i32) -> (i32, i32) {
    %c0_i32 = arith.constant 0 : i32
    %c0_i32_0 = arith.constant 0 : i32
    %c0_i32_1 = arith.constant 0 : i32
    return %c0_i32, %c0_i32_0 : i32, i32
  }
  func.func @transform_2(%arg0: i32) -> (i32, i32) {
    %c0_i32 = arith.constant 0 : i32
    %c0_i32_0 = arith.constant 0 : i32
    %c0_i32_1 = arith.constant 0 : i32
    return %c0_i32, %c0_i32_0 : i32, i32
  }
  func.func @transform_3(%arg0: i32) -> (i32, i32) {
    %c0_i32 = arith.constant 0 : i32
    %c0_i32_0 = arith.constant 0 : i32
    %c0_i32_1 = arith.constant 0 : i32
    return %c0_i32, %c0_i32_0 : i32, i32
  }
  func.func @transform_4(%arg0: i32) -> (i32, i32) {
    %c0_i32 = arith.constant 0 : i32
    %c0_i32_0 = arith.constant 0 : i32
    %c0_i32_1 = arith.constant 0 : i32
    return %c0_i32, %c0_i32_0 : i32, i32
  }
  func.func @transform_5(%arg0: i32) -> (i32, i32) {
    %c0_i32 = arith.constant 0 : i32
    %c0_i32_0 = arith.constant 0 : i32
    return %arg0, %c0_i32 : i32, i32
  }
}

</mosaic_0001>

<bundles_post_ra>
// kernel: tpu_custom_call.1
= control target key start
LH: loop header
LB: loop body
LE: loop exit
PB: predicated region body
PF: predicated region fallthrough
CT: control target
= control target key end

     0   :  { %10 = vsyncpa [#allocation3], 0  ;;  %s690_s0 = inlined_call_operand.hbm [shape: f32[16,128], index: 0, kind: input, shape index: {}]   ;;  %s691_s1 = inlined_call_operand.hbm [shape: bf16[128,128], index: 1, kind: input, shape index: {}]   ;;  %s692_s2 = inlined_call_operand.vmem [shape: f32[3,128], index: 2, kind: input, shape index: {}]   ;;  %s693_s3 = inlined_call_operand.hbm [shape: bf16[128,128], index: 3, kind: input, shape index: {}]   ;;  %s694_s4 = inlined_call_operand.vmem [shape: f32[1,128], index: 4, kind: input, shape index: {}]   ;;  %s695_s5 = inlined_call_operand.hbm [shape: f32[16,128], index: 5, kind: output, shape index: {}]  }
   0x1   :  { %11 = vsyncpa [#allocation6], 0 }
   0x2   :  { %12 = vsyncpa [#allocation4], 0  ;;  %s552_s18 = smov [#allocation5]   ;;  %s458_s22 = scalar_lea.hbm %s691_s1, 1024 }
   0x3   :  { %s30_s19 = sshll.u32 %s552_s18, 4  ;;  %p459_p0 = scmp.ne.s32.totalorder %s691_s1, %s458_s22  ;;  %s31_s19 = int_to_ptr.vmem [resolvable:$true] %s30_s19 }
   0x4   :  { %p462_p1 = scmp.lt.u32.totalorder %s458_s22, %s691_s1 }
   0x6   :  { %p464_p2 = pnand %p462_p1, %p459_p0 }
   0x8   :  { %467 = shalt.err (!%p464_p2)
}
   0x9   :  { %s468_s27 = scalar_lea.vmem %s31_s19, 1024  ;;  %p473_p4 = scmp.lt.s32.totalorder %s31_s19, %s31_s19 }
   0xa   :  { %p469_p3 = scmp.ne.s32.totalorder %s31_s19, %s468_s27  ;;  %p474_p5 = scmp.lt.s32.totalorder %s468_s27, %s468_s27 }
   0xc   :  { %p475_p6 = por %p474_p5, %p473_p4 }
   0xe   :  { %p476_p7 = pnand %p475_p6, %p469_p3 }
  0x10   :  { %479 = shalt.err (!%p476_p7)
}
  0x11   :  { %s553_s28 = smov 64   ;;  %s554_s29 = smov 4  }
  0x12   :  { %36 = dma.hbm_to_vmem [thread:$0]  %s691_s1, 1024, %s31_s19, [#allocation6], %s553_s28, %s553_s28, %s554_s29  }
  0x13   :  { %s555_s7 = smov [#allocation2]   ;;  %s480_s11 = scalar_lea.hbm %s690_s0, 256 }
  0x14   :  { %s18_s8 = sshll.u32 %s555_s7, 4  ;;  %p481_p8 = scmp.ne.s32.totalorder %s690_s0, %s480_s11  ;;  %s19_s8 = int_to_ptr.vmem [resolvable:$true] %s18_s8 }
  0x15   :  { %p484_p9 = scmp.lt.u32.totalorder %s480_s11, %s690_s0 }
  0x17   :  { %p486_p10 = pnand %p484_p9, %p481_p8 }
  0x19   :  { %489 = shalt.err (!%p486_p10)
}
  0x1a   :  { %s490_s16 = scalar_lea.vmem %s19_s8, 256  ;;  %p495_p12 = scmp.lt.s32.totalorder %s19_s8, %s19_s8 }
  0x1b   :  { %p491_p11 = scmp.ne.s32.totalorder %s19_s8, %s490_s16  ;;  %p496_p13 = scmp.lt.s32.totalorder %s490_s16, %s490_s16 }
  0x1d   :  { %p497_p0 = por %p496_p13, %p495_p12 }
  0x1f   :  { %p498_p1 = pnand %p497_p0, %p491_p11 }
  0x21   :  { %501 = shalt.err (!%p498_p1)
}
  0x22   :  { %s556_s1 = smov 128   ;;  %s557_s17 = smov 8  }
  0x23   :  { %24 = dma.hbm_to_vmem [thread:$0]  %s690_s0, 256, %s19_s8, [#allocation3], %s556_s1, %s556_s1, %s557_s17  }
  0x24   :  { %s558_s20 = smov [#allocation7]   ;;  %s502_s24 = scalar_lea.hbm %s693_s3, 1024 }
  0x25   :  { %s44_s21 = sshll.u32 %s558_s20, 4  ;;  %p503_p2 = scmp.ne.s32.totalorder %s693_s3, %s502_s24  ;;  %s45_s21 = int_to_ptr.vmem [resolvable:$true] %s44_s21 }
  0x26   :  { %p506_p3 = scmp.lt.u32.totalorder %s502_s24, %s693_s3 }
  0x28   :  { %p508_p4 = pnand %p506_p3, %p503_p2 }
  0x2a   :  { %511 = shalt.err (!%p508_p4)
}
  0x2b   :  { %s512_s6 = scalar_lea.vmem %s45_s21, 1024  ;;  %p517_p6 = scmp.lt.s32.totalorder %s45_s21, %s45_s21 }
  0x2c   :  { %p513_p5 = scmp.ne.s32.totalorder %s45_s21, %s512_s6  ;;  %p518_p7 = scmp.lt.s32.totalorder %s512_s6, %s512_s6 }
  0x2e   :  { %p519_p8 = por %p518_p7, %p517_p6 }
  0x30   :  { %p520_p9 = pnand %p519_p8, %p513_p5 }
  0x32   :  { %523 = shalt.err (!%p520_p9)
}
  0x33   :  { %50 = dma.hbm_to_vmem [thread:$0]  %s693_s3, 1024, %s45_s21, [#allocation6], %s553_s28, %s553_s28, %s554_s29  }
  0x34   :  { %546 = dma.done.wait [#allocation3], 256  }
  0x35   :  { %547 = vsyncadd [#allocation3], 4294967040 }
  0x36   :  { %548 = dma.done.wait [#allocation6], 2048  }
  0x37   :  { %549 = vsyncadd [#allocation6], 4294965248  ;;  %v559_v0 = vmov 0.0   ;;  %vm560_vm0 = vmmov 0   ;;  %v438_v1 = vld [vmem:[#allocation5] sm:$0xff]   ;;  %v439_v2 = vld [vmem:[#allocation5 + $0x8] sm:$0xff]  }
  0x38   :  { %388 = vmatprep.subr.bf16.mxu0 %v559_v0  ;;  %404 = vmatprep.mubr.msk.bf16.mxu0 %vm560_vm0, %v559_v0  ;;  %v440_v3 = vld [vmem:[#allocation5 + $0x10] sm:$0xff]   ;;  %v441_v4 = vld [vmem:[#allocation5 + $0x18] sm:$0xff]   ;;  %v442_v5 = vld [vmem:[#allocation5 + $0x20] sm:$0xff]  }
  0x39   :  { %408 = vmatprep.subr.bf16.mxu1 %v559_v0  ;;  %424 = vmatprep.mubr.msk.bf16.mxu1 %vm560_vm0, %v559_v0  ;;  %v443_v6 = vld [vmem:[#allocation5 + $0x28] sm:$0xff]   ;;  %v444_v7 = vld [vmem:[#allocation5 + $0x30] sm:$0xff]   ;;  %v445_v8 = vld [vmem:[#allocation5 + $0x38] sm:$0xff]  }
  0x3a   :  { %389 = vmatpush3.bf16.msra.mxu0 %v438_v1  ;;  %v647_v9 = vld [vmem:[#allocation2] sm:$0xff]  ;;  %v649_v10 = vld [vmem:[#allocation2 + $0x8] sm:$0xff]  ;;  %v446_v27 = vld [vmem:[#allocation7] sm:$0xff]  }
  0x3b   :  { %390 = vmatprep.subr.bf16.mxu0 %v559_v0  ;;  %v68_v11 = vpack.c.bf16 %v649_v10, %v647_v9  ;;  %v350_v12 = vld [vmem:[%s692_s2] ss:$0 sm:$0xff]  ;;  %409 = vmatpush3.bf16.msra.mxu1 %v446_v27  ;;  %v447_v28 = vld [vmem:[#allocation7 + $0x8] sm:$0xff]   ;;  %v449_v30 = vld [vmem:[#allocation7 + $0x18] sm:$0xff]  }
  0x3c   :  { %410 = vmatprep.subr.bf16.mxu1 %v559_v0  ;;  %v448_v29 = vld [vmem:[#allocation7 + $0x10] sm:$0xff]   ;;  %v450_v31 = vld [vmem:[#allocation7 + $0x20] sm:$0xff]   ;;  %v451_v32 = vld [vmem:[#allocation7 + $0x28] sm:$0xff]  }
  0x3d   :  { %v452_v33 = vld [vmem:[#allocation7 + $0x30] sm:$0xff]   ;;  %v453_v34 = vld [vmem:[#allocation7 + $0x38] sm:$0xff]  }
  0x3e   :  { %391 = vmatpush3.bf16.msra.mxu0 %v439_v2  ;;  %v359_v42 = vld [vmem:[%s692_s2 + $0x1] ss:$0 sm:$0xff]  ;;  %v360_v44 = vld [vmem:[%s692_s2 + $0x2] ss:$0 sm:$0xff]  ;;  %v361_v56 = vld [vmem:[%s694_s4] ss:$0 sm:$0xff] }
  0x3f   :  { %392 = vmatprep.subr.bf16.mxu0 %v559_v0  ;;  %411 = vmatpush3.bf16.msra.mxu1 %v447_v28  ;;  %s561_s2 = smov [#allocation8]  }
  0x40   :  { %412 = vmatprep.subr.bf16.mxu1 %v559_v0  ;;  %s337_s13 = sshll.u32 %s561_s2, 4  ;;  %s338_s13 = int_to_ptr.vmem [resolvable:$true] %s337_s13 }
  0x41   :  { %s524_s14 = scalar_lea.vmem %s338_s13, 256  ;;  %p529_p11 = scmp.lt.s32.totalorder %s338_s13, %s338_s13 }
  0x42   :  { %393 = vmatpush3.bf16.msra.mxu0 %v440_v3  ;;  %p525_p10 = scmp.ne.s32.totalorder %s338_s13, %s524_s14  ;;  %p530_p12 = scmp.lt.s32.totalorder %s524_s14, %s524_s14 }
  0x43   :  { %394 = vmatprep.subr.bf16.mxu0 %v559_v0  ;;  %413 = vmatpush3.bf16.msra.mxu1 %v448_v29 }
  0x44   :  { %414 = vmatprep.subr.bf16.mxu1 %v559_v0  ;;  %p531_p13 = por %p530_p12, %p529_p11 }
  0x46   :  { %395 = vmatpush3.bf16.msra.mxu0 %v441_v4  ;;  %p532_p0 = pnand %p531_p13, %p525_p10 }
  0x47   :  { %396 = vmatprep.subr.bf16.mxu0 %v559_v0  ;;  %415 = vmatpush3.bf16.msra.mxu1 %v449_v30 }
  0x48   :  { %416 = vmatprep.subr.bf16.mxu1 %v559_v0 }
  0x4a   :  { %397 = vmatpush3.bf16.msra.mxu0 %v442_v5 }
  0x4b   :  { %398 = vmatprep.subr.bf16.mxu0 %v559_v0  ;;  %417 = vmatpush3.bf16.msra.mxu1 %v450_v31 }
  0x4c   :  { %418 = vmatprep.subr.bf16.mxu1 %v559_v0 }
  0x4e   :  { %399 = vmatpush3.bf16.msra.mxu0 %v443_v6 }
  0x4f   :  { %400 = vmatprep.subr.bf16.mxu0 %v559_v0  ;;  %419 = vmatpush3.bf16.msra.mxu1 %v451_v32 }
  0x50   :  { %420 = vmatprep.subr.bf16.mxu1 %v559_v0 }
  0x52   :  { %401 = vmatpush3.bf16.msra.mxu0 %v444_v7 }
  0x53   :  { %402 = vmatprep.subr.bf16.mxu0 %v559_v0  ;;  %421 = vmatpush3.bf16.msra.mxu1 %v452_v33 }
  0x54   :  { %422 = vmatprep.subr.bf16.mxu1 %v559_v0 }
  0x56   :  { %403 = vmatpush3.bf16.msra.mxu0 %v445_v8 }
  0x57   :  { %423 = vmatpush3.bf16.msra.mxu1 %v453_v34 }
  0x59   :  { %405 = vmatmul.mubr.bf16.vlgmr.msra.gmra.mrb[0].mxu0 %v68_v11 }
 0x12c   :  { %v171_v13 = vpop.f32.mrb[0].mxu0 }
 0x12d   :  { %v172_v14 = vadd.f32 %v350_v12, %v171_v13  ;;  %v406_v15 = vpop.f32.mrb[1].mxu0 }
 0x12e   :  { %v174_v16 = vpop.f32.mrb[2].mxu0 }
 0x12f   :  { %178 = vadd.xlane.f32.xlu0 %v172_v14  ;;  %v407_v17 = vpop.f32.mrb[3].mxu0  ;;  %v175_v18 = vadd.f32 %v350_v12, %v174_v16 }
 0x133   :  { %180 = vadd.xlane.f32.xlu0 %v175_v18 }
 0x1bc   :  { %v179_v19 = vpop.xlane.xlu0 %178 }
 0x1bd   :  { %v183_v20 = vmul.f32 0.0078125, %v179_v19 }
 0x1bf   :  { %v185_v21 = vsub.f32 %v172_v14, %v183_v20 }
 0x1c0   :  { %v181_v22 = vpop.xlane.xlu0 %180 }
 0x1c1   :  { %v184_v23 = vmul.f32 0.0078125, %v181_v22  ;;  %v187_v24 = vmul.f32 %v185_v21, %v185_v21 }
 0x1c3   :  { %v186_v25 = vsub.f32 %v175_v18, %v184_v23  ;;  %189 = vadd.xlane.f32.xlu1 %v187_v24 }
 0x1c5   :  { %v188_v26 = vmul.f32 %v186_v25, %v186_v25 }
 0x1c7   :  { %191 = vadd.xlane.f32.xlu1 %v188_v26 }
 0x250   :  { %v190_v35 = vpop.xlane.xlu1 %189 }
 0x251   :  { %v193_v36 = vmul.f32 0.0078125, %v190_v35 }
 0x253   :  { %v195_v37 = vadd.f32 1e-05, %v193_v36 }
 0x254   :  { %v192_v38 = vpop.xlane.xlu1 %191 }
 0x255   :  { %454 = vrsqrt.f32 %v195_v37  ;;  %v194_v39 = vmul.f32 0.0078125, %v192_v38 }
 0x257   :  { %v196_v40 = vadd.f32 1e-05, %v194_v39 }
 0x259   :  { %456 = vrsqrt.f32 %v196_v40 }
 0x25f   :  { %v455_v41 = vpop.eup %454 }
 0x260   :  { %v199_v43 = vmul.f32 %v455_v41, %v185_v21 }
 0x262   :  { %v205_v45 = vmul.f32 %v359_v42, %v199_v43 }
 0x263   :  { %v457_v46 = vpop.eup %456 }
 0x264   :  { %v200_v47 = vmul.f32 %v457_v46, %v186_v25  ;;  %v211_v48 = vadd.f32 %v360_v44, %v205_v45 }
 0x266   :  { %v206_v49 = vmul.f32 %v359_v42, %v200_v47  ;;  %v213_v51 = vmax.f32 %v211_v48, 0.0 }
 0x268   :  { %v212_v50 = vadd.f32 %v360_v44, %v206_v49  ;;  %v215_v53 = vadd.f32 %v213_v51, %v647_v9 }
 0x26a   :  { %v214_v52 = vmax.f32 %v212_v50, 0.0 }
 0x26c   :  { %v216_v54 = vadd.f32 %v214_v52, %v649_v10 }
 0x26e   :  { %v217_v55 = vpack.c.bf16 %v216_v54, %v215_v53 }
 0x270   :  { %425 = vmatmul.mubr.bf16.vlgmr.msra.gmra.mrb[0].mxu1 %v217_v55 }
 0x343   :  { %v323_v57 = vpop.f32.mrb[0].mxu1 }
 0x344   :  { %v324_v58 = vadd.f32 %v361_v56, %v323_v57  ;;  %v426_v59 = vpop.f32.mrb[1].mxu1 }
 0x345   :  { %v326_v60 = vpop.f32.mrb[2].mxu1 }
 0x346   :  { %330 = vst [vmem:[#allocation8] sm:$0xff] %v324_v58  ;;  %v327_v61 = vadd.f32 %v361_v56, %v326_v60  ;;  %v427_v62 = vpop.f32.mrb[3].mxu1 }
 0x348   :  { %331 = vst [vmem:[#allocation8 + $0x8] sm:$0xff] %v327_v61 }
 0x349   :  { %535 = shalt.err (!%p532_p0)
}
 0x34a   :  { %s536_s16 = scalar_lea.hbm %s695_s5, 256 }
 0x34b   :  { %p537_p1 = scmp.ne.s32.totalorder %s695_s5, %s536_s16  ;;  %p540_p2 = scmp.lt.u32.totalorder %s536_s16, %s695_s5 }
 0x34d   :  { %p542_p3 = pnand %p540_p2, %p537_p1 }
 0x34f   :  { %545 = shalt.err (!%p542_p3)
}
 0x350   :  { %343 = dma.vmem_to_hbm [thread:$0]  %s338_s13, 256, %s695_s5, [#allocation4], %s556_s1, %s556_s1, %s557_s17  }
 0x351   :  { %550 = dma.done.wait [#allocation4], 256  }
 0x352   :  { %551 = vsyncadd [#allocation4], 4294967040 }
 0x353   :  { %347 = vsyncpa [#allocation3], 1 }
 0x354   :  { %348 = vsyncpa [#allocation6], 1 }
 0x355   :  { %349 = vsyncpa [#allocation4], 1 }

</bundles_post_ra>
